<compile_context>
chip_gen: v7x
topology: tpu7x:2x2x1
jax: 0.10.0
libtpu: 0.0.40
codegen_flags: <defaults>
</compile_context>

<pallas_src>
import jax
import jax.numpy as jnp
from jax import lax
from jax.experimental import pallas as pl
from jax.experimental.pallas import tpu as pltpu

K = 9          # kernel_size
P = 4          # padding
EPS = 1e-5     # BatchNorm eps


def _round_up(a, b):
    return (a + b - 1) // b * b


def _make_kernel(L, Lt, C16, use_im2col):
    Wp = Lt + 2 * P                       # conv1 output width per tile (padded geom)

    def kernel(xw_ref, res_ref, w1_ref, w2_ref, b1_ref, b2_ref, o_ref):
        # xw_ref:  (1, 1, C16, Lt + 4P) bf16  input window (halo of 2P each side)
        # res_ref: (1, C16, Lt)         f32   residual (original x, lane-aligned)
        # w1_ref:  (C16, K*C16)         bf16  conv1 weight, BN1 scale folded, tap-major
        # w2_ref:  (C16, K*C16)         bf16  conv2 weight, BN2 scale folded, tap-major
        # b1_ref:  (C16, 1)             f32   folded BN1 bias
        # b2_ref:  (C16, 1)             f32   folded BN2 bias
        # o_ref:   (1, C16, Lt)         f32
        l = pl.program_id(1)
        xw = xw_ref[0, 0]                                     # (C16, Lt + 4P) bf16

        def conv(a, w_ref, width):
            if use_im2col:
                # One deep MXU matmul over K*C16 (pays only while C16 is shallow).
                slab = jnp.concatenate([a[:, k:k + width] for k in range(K)],
                                       axis=0)                # (K*C16, width)
                return jnp.dot(w_ref[...], slab,
                               preferred_element_type=jnp.float32)
            # Per-tap accumulation: K matmuls of contraction depth C16, no slab.
            acc = jnp.zeros((C16, width), jnp.float32)
            for k in range(K):
                acc += jnp.dot(w_ref[:, k * C16:(k + 1) * C16],
                               a[:, k:k + width],
                               preferred_element_type=jnp.float32)
            return acc

        # ---- conv1 (+ folded BN1 scale), computed at Lt + 2P positions ----
        acc1 = conv(xw, w1_ref, Wp)                           # (C16, Wp) f32

        # ---- BN1 bias + ReLU (dropout p=0.0 -> identity); zero positions whose
        #      global index is outside [0, L): those are conv2's zero padding. ----
        g = lax.broadcasted_iota(jnp.int32, (C16, Wp), 1) + l * Lt
        h = jnp.maximum(acc1 + b1_ref[...], 0.0)
        h = jnp.where((g >= P) & (g < L + P), h, 0.0).astype(jnp.bfloat16)

        # ---- conv2 (+ folded BN2 scale) ----
        acc2 = conv(h, w2_ref, Lt)                            # (C16, Lt) f32

        # ---- BN2 bias + residual add (f32) + ReLU ----
        out = acc2 + b2_ref[...] + res_ref[0]
        o_ref[0] = jnp.maximum(out, 0.0).astype(o_ref.dtype)

    return kernel


def _const_spec(shape):
    """BlockSpec for a grid-invariant input; single-buffered when supported."""
    idx = lambda n, l: (0,) * len(shape)
    try:
        return pl.BlockSpec(shape, idx, pipeline_mode=pl.Buffered(1))
    except TypeError:                      # older BlockSpec signature fallback
        return pl.BlockSpec(shape, idx)


def basic_block_1d(x, w1, w2, gamma1, beta1, mean1, var1,
                   gamma2, beta2, mean2, var2,
                   *, lt_max=1024, use_im2col=None):
    """x: (N, C, L) float32, w*: (C, C, K) float32. Returns (N, C, L) f32."""
    N, C, L = x.shape
    C16 = _round_up(C, 16)                 # channel padding -> aligned bf16 tiles
    if use_im2col is None:
        # Deep im2col matmul only helps while the contraction (C16) is shallow;
        # for C16 >= 128 the per-tap path avoids the slab's VMEM/XLU/vst traffic.
        use_im2col = C16 < 128

    # Lane-dense L tiling: Lt % 128 == 0, L_pad = n_lt * Lt.
    L128 = _round_up(L, 128)
    n_lt = pl.cdiv(L128, lt_max)
    Lt = _round_up(pl.cdiv(L128, n_lt), 128)
    L_pad = Lt * n_lt

    # ---- fold eval-mode BatchNorm into the conv weights (scale) + a bias ----
    inv1 = gamma1 / jnp.sqrt(var1 + EPS)
    inv2 = gamma2 / jnp.sqrt(var2 + EPS)
    b1 = jnp.zeros((C16, 1), jnp.float32).at[:C, 0].set(beta1 - mean1 * inv1)
    b2 = jnp.zeros((C16, 1), jnp.float32).at[:C, 0].set(beta2 - mean2 * inv2)

    def flatten_weight(w, inv):
        ws = w * inv[:, None, None]                                # scale fold
        wp = jnp.zeros((C16, C16, K), jnp.float32).at[:C, :C, :].set(ws)
        # (C_out, C_in, K) -> (C_out, K, C_in) -> (C_out, K*C_in): tap-major
        # columns match both the im2col slab rows and the per-tap slices.
        return jnp.transpose(wp, (0, 2, 1)).reshape(C16, K * C16) \
                  .astype(jnp.bfloat16)

    w1f = flatten_weight(w1, inv1)
    w2f = flatten_weight(w2, inv2)

    # ---- residual: f32, channel- and length-padded, lane-aligned ----
    x_res = jnp.pad(x, ((0, 0), (0, C16 - C), (0, L_pad - L)))       # (N,C16,L_pad)

    # ---- conv input: bf16, zero-padded by 2P each side, pre-materialized as
    #      overlapping (Lt + 4P)-wide windows so each L tile carries its halo ----
    x_pad = jnp.pad(x, ((0, 0), (0, C16 - C), (2 * P, 2 * P + L_pad - L))
                    ).astype(jnp.bfloat16)                           # (N,C16,L_pad+4P)
    x_win = jnp.stack(
        [x_pad[:, :, i * Lt:i * Lt + Lt + 4 * P] for i in range(n_lt)],
        axis=1)                                                      # (N,n_lt,C16,Lt+4P)

    kernel = _make_kernel(L, Lt, C16, use_im2col)

    grid_spec = pltpu.PrefetchScalarGridSpec(
        num_scalar_prefetch=0,
        grid=(N, n_lt),
        in_specs=[
            pl.BlockSpec((1, 1, C16, Lt + 4 * P), lambda n, l: (n, l, 0, 0)),
            pl.BlockSpec((1, C16, Lt), lambda n, l: (n, 0, l)),
            _const_spec((C16, K * C16)),     # w1 (resident, single-buffered)
            _const_spec((C16, K * C16)),     # w2
            _const_spec((C16, 1)),           # b1
            _const_spec((C16, 1)),           # b2
        ],
        out_specs=pl.BlockSpec((1, C16, Lt), lambda n, l: (n, 0, l)),
    )

    flops = 4 * K * C * C * L * N                    # 2 convs, 2 flops per MAC
    bytes_accessed = int(x_win.size * 2 + x_res.size * 4 + N * C16 * L_pad * 4
                         + 2 * w1f.size * 2 + 2 * b1.size * 4)

    out = pl.pallas_call(
        kernel,
        out_shape=jax.ShapeDtypeStruct((N, C16, L_pad), jnp.float32),
        grid_spec=grid_spec,
        compiler_params=pltpu.CompilerParams(
            dimension_semantics=("parallel", "parallel"),
            vmem_limit_bytes=64 * 1024 * 1024),
        cost_estimate=pl.CostEstimate(flops=flops, transcendentals=0,
                                      bytes_accessed=bytes_accessed),
    )(x_win, x_res, w1f, w2f, b1, b2)

    # TODO(synk): emit bf16 here instead of f32 if downstream consumers allow it.
    return out[:, :C, :L]


def reference(x, w1, w2, gamma1, beta1, mean1, var1, gamma2, beta2, mean2, var2):
    """Pure-JAX f32 reference using lax.conv_general_dilated (NCL layout)."""
    dn = ('NCH', 'OIH', 'NCH')

    def conv(a, w):
        return lax.conv_general_dilated(a, w, window_strides=(1,),
                                        padding=[(P, P)],
                                        dimension_numbers=dn)

    def bn(a, g, b, m, v):
        return (a - m[None, :, None]) / jnp.sqrt(v[None, :, None] + EPS) \
               * g[None, :, None] + b[None, :, None]

    out = jnp.maximum(bn(conv(x, w1), gamma1, beta1, mean1, var1), 0.0)
    out = bn(conv(out, w2), gamma2, beta2, mean2, var2)
    return jnp.maximum(out + x, 0.0)


if __name__ == "__main__":
    # Shapes consistent with the module: in_channels == out_channels
    # (downsample=None), kernel_size=9, stride=1, padding=4.
    C = 4
    key = jax.random.PRNGKey(0)
    (k_x, k_x2, k_w1, k_w2, k_g1, k_b1, k_m1, k_v1,
     k_g2, k_b2, k_m2, k_v2) = jax.random.split(key, 12)

    w1 = jax.random.normal(k_w1, (C, C, K), dtype=jnp.float32) * 0.1
    w2 = jax.random.normal(k_w2, (C, C, K), dtype=jnp.float32) * 0.1
    gamma1 = 1.0 + 0.1 * jax.random.normal(k_g1, (C,), dtype=jnp.float32)
    beta1 = 0.1 * jax.random.normal(k_b1, (C,), dtype=jnp.float32)
    mean1 = 0.1 * jax.random.normal(k_m1, (C,), dtype=jnp.float32)
    var1 = 1.0 + 0.1 * jnp.abs(jax.random.normal(k_v1, (C,), dtype=jnp.float32))
    gamma2 = 1.0 + 0.1 * jax.random.normal(k_g2, (C,), dtype=jnp.float32)
    beta2 = 0.1 * jax.random.normal(k_b2, (C,), dtype=jnp.float32)
    mean2 = 0.1 * jax.random.normal(k_m2, (C,), dtype=jnp.float32)
    var2 = 1.0 + 0.1 * jnp.abs(jax.random.normal(k_v2, (C,), dtype=jnp.float32))
    params = (w1, w2, gamma1, beta1, mean1, var1, gamma2, beta2, mean2, var2)

    # Test 1: default path (deep im2col matmul for small C), single L tile.
    N, L = 2, 16
    x = jax.random.normal(k_x, (N, C, L), dtype=jnp.float32)
    out = jax.block_until_ready(basic_block_1d(x, *params))
    ref = reference(x, *params)
    assert out.shape == (N, C, L)
    assert jnp.allclose(out, ref, atol=5e-2, rtol=5e-2), \
        f"im2col path max err {jnp.max(jnp.abs(out - ref))}"

    # Test 2: per-tap accumulation path + multiple L tiles with halo handling.
    N2, L2 = 2, 300
    x2 = jax.random.normal(k_x2, (N2, C, L2), dtype=jnp.float32)
    out2 = jax.block_until_ready(
        basic_block_1d(x2, *params, lt_max=128, use_im2col=False))
    ref2 = reference(x2, *params)
    assert out2.shape == (N2, C, L2)
    assert jnp.allclose(out2, ref2, atol=5e-2, rtol=5e-2), \
        f"per-tap path max err {jnp.max(jnp.abs(out2 - ref2))}"

    print("KERNEL_OK")
</pallas_src>

<mosaic_0001>
module attributes {stable_mosaic.version = 11 : i64} {
  func.func @kernel(%arg0: i32, %arg1: i32, %arg2: memref<1x1x16x144xbf16, #tpu.memory_space<vmem>>, %arg3: memref<1x16x128xf32, #tpu.memory_space<vmem>>, %arg4: memref<16x144xbf16, #tpu.memory_space<vmem>>, %arg5: memref<16x144xbf16, #tpu.memory_space<vmem>>, %arg6: memref<16x1xf32, #tpu.memory_space<vmem>>, %arg7: memref<16x1xf32, #tpu.memory_space<vmem>>, %arg8: memref<1x16x128xf32, #tpu.memory_space<vmem>>) attributes {dimension_semantics = [#tpu.dimension_semantics<parallel>, #tpu.dimension_semantics<parallel>], iteration_bounds = array<i64: 2, 1>, scalar_prefetch = 0 : i64, scratch_operands = 0 : i64, tpu.core_type = #tpu.core_type<tc>, window_params = [{transform_indices = @transform_0, window_bounds = array<i64: 1, 1, 16, 144>}, {transform_indices = @transform_1, window_bounds = array<i64: 1, 16, 128>}, {pipeline_mode = #tpu.pipeline_mode<synchronous>, transform_indices = @transform_2, window_bounds = array<i64: 16, 144>}, {pipeline_mode = #tpu.pipeline_mode<synchronous>, transform_indices = @transform_3, window_bounds = array<i64: 16, 144>}, {pipeline_mode = #tpu.pipeline_mode<synchronous>, transform_indices = @transform_4, window_bounds = array<i64: 16, 1>}, {pipeline_mode = #tpu.pipeline_mode<synchronous>, transform_indices = @transform_5, window_bounds = array<i64: 16, 1>}, {transform_indices = @transform_6, window_bounds = array<i64: 1, 16, 128>}]} {
    %c0 = arith.constant 0 : index
    %c0_0 = arith.constant 0 : index
    %c0_1 = arith.constant 0 : index
    %c0_2 = arith.constant 0 : index
    %0 = vector.load %arg2[%c0, %c0_0, %c0_1, %c0_2] : memref<1x1x16x144xbf16, #tpu.memory_space<vmem>>, vector<1x1x16x144xbf16>
    %1 = vector.shape_cast %0 : vector<1x1x16x144xbf16> to vector<16x144xbf16>
    %2 = vector.extract_strided_slice %1 {offsets = [0, 0], sizes = [16, 136], strides = [1, 1]} : vector<16x144xbf16> to vector<16x136xbf16>
    %3 = vector.extract_strided_slice %1 {offsets = [0, 1], sizes = [16, 136], strides = [1, 1]} : vector<16x144xbf16> to vector<16x136xbf16>
    %4 = vector.extract_strided_slice %1 {offsets = [0, 2], sizes = [16, 136], strides = [1, 1]} : vector<16x144xbf16> to vector<16x136xbf16>
    %5 = vector.extract_strided_slice %1 {offsets = [0, 3], sizes = [16, 136], strides = [1, 1]} : vector<16x144xbf16> to vector<16x136xbf16>
    %6 = vector.extract_strided_slice %1 {offsets = [0, 4], sizes = [16, 136], strides = [1, 1]} : vector<16x144xbf16> to vector<16x136xbf16>
    %7 = vector.extract_strided_slice %1 {offsets = [0, 5], sizes = [16, 136], strides = [1, 1]} : vector<16x144xbf16> to vector<16x136xbf16>
    %8 = vector.extract_strided_slice %1 {offsets = [0, 6], sizes = [16, 136], strides = [1, 1]} : vector<16x144xbf16> to vector<16x136xbf16>
    %9 = vector.extract_strided_slice %1 {offsets = [0, 7], sizes = [16, 136], strides = [1, 1]} : vector<16x144xbf16> to vector<16x136xbf16>
    %10 = vector.extract_strided_slice %1 {offsets = [0, 8], sizes = [16, 136], strides = [1, 1]} : vector<16x144xbf16> to vector<16x136xbf16>
    %11 = tpu.concatenate %2, %3, %4, %5, %6, %7, %8, %9, %10 in 0 : vector<16x136xbf16>, vector<16x136xbf16>, vector<16x136xbf16>, vector<16x136xbf16>, vector<16x136xbf16>, vector<16x136xbf16>, vector<16x136xbf16>, vector<16x136xbf16>, vector<16x136xbf16> -> vector<144x136xbf16>
    %c0_3 = arith.constant 0 : index
    %c0_4 = arith.constant 0 : index
    %12 = vector.load %arg4[%c0_3, %c0_4] : memref<16x144xbf16, #tpu.memory_space<vmem>>, vector<16x144xbf16>
    %cst = arith.constant dense<0.000000e+00> : vector<16x136xf32>
    %13 = tpu.matmul %12, %11, %cst {dimension_numbers = #tpu.dot_dimension_numbers<[1], [0], [0], [1], [0, 0, 1, 1], [], []>} : vector<16x144xbf16>, vector<144x136xbf16>, vector<16x136xf32> -> vector<16x136xf32>
    %14 = tpu.iota {dimensions = array<i32: 1>} : vector<16x136xi32>
    %c128_i32 = arith.constant 128 : i32
    %15 = arith.muli %arg1, %c128_i32 : i32
    %16 = vector.broadcast %15 : i32 to vector<16x136xi32>
    %17 = arith.addi %14, %16 : vector<16x136xi32>
    %c0_5 = arith.constant 0 : index
    %c0_6 = arith.constant 0 : index
    %18 = vector.load %arg6[%c0_5, %c0_6] : memref<16x1xf32, #tpu.memory_space<vmem>>, vector<16x1xf32>
    %19 = vector.broadcast %18 : vector<16x1xf32> to vector<16x136xf32>
    %20 = arith.addf %13, %19 : vector<16x136xf32>
    %cst_7 = arith.constant 0.000000e+00 : f32
    %21 = vector.broadcast %cst_7 : f32 to vector<16x136xf32>
    %22 = arith.maximumf %20, %21 : vector<16x136xf32>
    %c4_i32 = arith.constant 4 : i32
    %23 = vector.broadcast %c4_i32 : i32 to vector<16x136xi32>
    %24 = arith.cmpi sge, %17, %23 : vector<16x136xi32>
    %c20_i32 = arith.constant 20 : i32
    %25 = vector.broadcast %c20_i32 : i32 to vector<16x136xi32>
    %26 = arith.cmpi slt, %17, %25 : vector<16x136xi32>
    %27 = arith.andi %24, %26 : vector<16x136xi1>
    %cst_8 = arith.constant 0.000000e+00 : f32
    %28 = vector.broadcast %cst_8 : f32 to vector<16x136xf32>
    %29 = arith.select %27, %22, %28 : vector<16x136xi1>, vector<16x136xf32>
    %30 = arith.truncf %29 : vector<16x136xf32> to vector<16x136xbf16>
    %31 = vector.extract_strided_slice %30 {offsets = [0, 0], sizes = [16, 128], strides = [1, 1]} : vector<16x136xbf16> to vector<16x128xbf16>
    %32 = vector.extract_strided_slice %30 {offsets = [0, 1], sizes = [16, 128], strides = [1, 1]} : vector<16x136xbf16> to vector<16x128xbf16>
    %33 = vector.extract_strided_slice %30 {offsets = [0, 2], sizes = [16, 128], strides = [1, 1]} : vector<16x136xbf16> to vector<16x128xbf16>
    %34 = vector.extract_strided_slice %30 {offsets = [0, 3], sizes = [16, 128], strides = [1, 1]} : vector<16x136xbf16> to vector<16x128xbf16>
    %35 = vector.extract_strided_slice %30 {offsets = [0, 4], sizes = [16, 128], strides = [1, 1]} : vector<16x136xbf16> to vector<16x128xbf16>
    %36 = vector.extract_strided_slice %30 {offsets = [0, 5], sizes = [16, 128], strides = [1, 1]} : vector<16x136xbf16> to vector<16x128xbf16>
    %37 = vector.extract_strided_slice %30 {offsets = [0, 6], sizes = [16, 128], strides = [1, 1]} : vector<16x136xbf16> to vector<16x128xbf16>
    %38 = vector.extract_strided_slice %30 {offsets = [0, 7], sizes = [16, 128], strides = [1, 1]} : vector<16x136xbf16> to vector<16x128xbf16>
    %39 = vector.extract_strided_slice %30 {offsets = [0, 8], sizes = [16, 128], strides = [1, 1]} : vector<16x136xbf16> to vector<16x128xbf16>
    %40 = tpu.concatenate %31, %32, %33, %34, %35, %36, %37, %38, %39 in 0 : vector<16x128xbf16>, vector<16x128xbf16>, vector<16x128xbf16>, vector<16x128xbf16>, vector<16x128xbf16>, vector<16x128xbf16>, vector<16x128xbf16>, vector<16x128xbf16>, vector<16x128xbf16> -> vector<144x128xbf16>
    %c0_9 = arith.constant 0 : index
    %c0_10 = arith.constant 0 : index
    %41 = vector.load %arg5[%c0_9, %c0_10] : memref<16x144xbf16, #tpu.memory_space<vmem>>, vector<16x144xbf16>
    %cst_11 = arith.constant dense<0.000000e+00> : vector<16x128xf32>
    %42 = tpu.matmul %41, %40, %cst_11 {dimension_numbers = #tpu.dot_dimension_numbers<[1], [0], [0], [1], [0, 0, 1, 1], [], []>} : vector<16x144xbf16>, vector<144x128xbf16>, vector<16x128xf32> -> vector<16x128xf32>
    %c0_12 = arith.constant 0 : index
    %c0_13 = arith.constant 0 : index
    %43 = vector.load %arg7[%c0_12, %c0_13] : memref<16x1xf32, #tpu.memory_space<vmem>>, vector<16x1xf32>
    %44 = vector.broadcast %43 : vector<16x1xf32> to vector<16x128xf32>
    %45 = arith.addf %42, %44 : vector<16x128xf32>
    %c0_14 = arith.constant 0 : index
    %c0_15 = arith.constant 0 : index
    %c0_16 = arith.constant 0 : index
    %46 = vector.load %arg3[%c0_14, %c0_15, %c0_16] : memref<1x16x128xf32, #tpu.memory_space<vmem>>, vector<1x16x128xf32>
    %47 = vector.shape_cast %46 : vector<1x16x128xf32> to vector<16x128xf32>
    %48 = arith.addf %45, %47 : vector<16x128xf32>
    %cst_17 = arith.constant 0.000000e+00 : f32
    %49 = vector.broadcast %cst_17 : f32 to vector<16x128xf32>
    %50 = arith.maximumf %48, %49 : vector<16x128xf32>
    %c0_18 = arith.constant 0 : index
    %c0_19 = arith.constant 0 : index
    %c0_20 = arith.constant 0 : index
    %51 = vector.load %arg8[%c0_18, %c0_19, %c0_20] : memref<1x16x128xf32, #tpu.memory_space<vmem>>, vector<1x16x128xf32>
    %52 = vector.shape_cast %51 : vector<1x16x128xf32> to vector<16x128xf32>
    %53 = vector.shape_cast %50 : vector<16x128xf32> to vector<1x16x128xf32>
    tpu.vector_store %arg8[%c0_18, %c0_19, %c0_20], %53 {strides = array<i32>} : memref<1x16x128xf32, #tpu.memory_space<vmem>>, vector<1x16x128xf32>,
    return
  }
  func.func @transform_0(%arg0: i32, %arg1: i32) -> (i32, i32, i32, i32) {
    %c0_i32 = arith.constant 0 : i32
    %c0_i32_0 = arith.constant 0 : i32
    %c0_i32_1 = arith.constant 0 : i32
    return %arg0, %arg1, %c0_i32, %c0_i32_0 : i32, i32, i32, i32
  }
  func.func @transform_1(%arg0: i32, %arg1: i32) -> (i32, i32, i32) {
    %c0_i32 = arith.constant 0 : i32
    %c0_i32_0 = arith.constant 0 : i32
    return %arg0, %c0_i32, %arg1 : i32, i32, i32
  }
  func.func @transform_2(%arg0: i32, %arg1: i32) -> (i32, i32) {
    %c0_i32 = arith.constant 0 : i32
    %c0_i32_0 = arith.constant 0 : i32
    %c0_i32_1 = arith.constant 0 : i32
    return %c0_i32, %c0_i32_0 : i32, i32
  }
  func.func @transform_3(%arg0: i32, %arg1: i32) -> (i32, i32) {
    %c0_i32 = arith.constant 0 : i32
    %c0_i32_0 = arith.constant 0 : i32
    %c0_i32_1 = arith.constant 0 : i32
    return %c0_i32, %c0_i32_0 : i32, i32
  }
  func.func @transform_4(%arg0: i32, %arg1: i32) -> (i32, i32) {
    %c0_i32 = arith.constant 0 : i32
    %c0_i32_0 = arith.constant 0 : i32
    %c0_i32_1 = arith.constant 0 : i32
    return %c0_i32, %c0_i32_0 : i32, i32
  }
  func.func @transform_5(%arg0: i32, %arg1: i32) -> (i32, i32) {
    %c0_i32 = arith.constant 0 : i32
    %c0_i32_0 = arith.constant 0 : i32
    %c0_i32_1 = arith.constant 0 : i32
    return %c0_i32, %c0_i32_0 : i32, i32
  }
  func.func @transform_6(%arg0: i32, %arg1: i32) -> (i32, i32, i32) {
    %c0_i32 = arith.constant 0 : i32
    %c0_i32_0 = arith.constant 0 : i32
    return %arg0, %c0_i32, %arg1 : i32, i32, i32
  }
}

</mosaic_0001>

<bundles_post_ra>
// kernel: tpu_custom_call.1
= control target key start
LH: loop header
LB: loop body
LE: loop exit
PB: predicated region body
PF: predicated region fallthrough
CT: control target
= control target key end

     0   :  { %s1779_s0 = inlined_call_operand.hbm [shape: bf16[2,1,16,144], index: 0, kind: input, shape index: {}]   ;;  %s1780_s1 = inlined_call_operand.hbm [shape: f32[2,16,128], index: 1, kind: input, shape index: {}]   ;;  %s1781_s2 = inlined_call_operand.hbm [shape: bf16[16,144], index: 2, kind: input, shape index: {}]   ;;  %s1782_s3 = inlined_call_operand.hbm [shape: bf16[16,144], index: 3, kind: input, shape index: {}]   ;;  %s1783_s4 = inlined_call_operand.hbm [shape: f32[16,1], index: 4, kind: input, shape index: {}]   ;;  %s1784_s5 = inlined_call_operand.hbm [shape: f32[16,1], index: 5, kind: input, shape index: {}]   ;;  %s1785_s6 = inlined_call_operand.hbm [shape: f32[2,16,128], index: 6, kind: output, shape index: {}]  }
   0x1   :  { %1795 = sst [smem:[#allocation22_spill]] %s1779_s0 }
   0x2   :  { %1796 = sst [smem:[#allocation23_spill]] %s1781_s2 }
   0x3   :  { %1797 = sst [smem:[#allocation24_spill]] %s1782_s3 }
   0x4   :  { %1798 = sst [smem:[#allocation25_spill]] %s1783_s4 }
   0x5   :  { %1799 = sst [smem:[#allocation26_spill]] %s1784_s5 }
   0x6   :  { %11 = vsyncpa [#allocation3], 0 }
   0x7   :  { %13 = vsyncpa [#allocation3 + $0x1], 0 }
   0x8   :  { %14 = vsyncpa [#allocation6], 0 }
   0x9   :  { %16 = vsyncpa [#allocation6 + $0x1], 0 }
   0xa   :  { %17 = vsyncpa [#allocation9], 0 }
   0xb   :  { %18 = vsyncpa [#allocation12], 0 }
   0xc   :  { %19 = vsyncpa [#allocation4], 0 }
   0xd   :  { %21 = vsyncpa [#allocation4 + $0x1], 0  ;;  %s1350_s21 = smov 0   ;;  %s1352_s22 = smov 0  }
   0xe   :  { %s1354_s23 = smov 0   ;;  %s1356_s24 = smov 0  }
   0xf   :  { %s1358_s25 = smov 0   ;;  %s1360_s26 = smov 0  }
  0x10 LB: > { %1800 = sst [smem:[#allocation20_spill]] %s1272_s21  ;;  %s1381_s27 = sadd.s32 4294967295, %s1292_s26   ;;  %s1292_s26 = sphi %s1360_s26, %s27_s26   ;;  %s1288_s25 = sphi %s1358_s25, %s1833_s25   ;;  %s1284_s24 = sphi %s1356_s24, %s1832_s24   ;;  %s1280_s23 = sphi %s1354_s23, %s1831_s23   ;;  %s1276_s22 = sphi %s1352_s22, %s1830_s22   ;;  %s1272_s21 = sphi %s1350_s21, %s1829_s21  }
  0x11   : > { %s849_s28 = sadd.s32 4294967294, %s1292_s26   ;;  %p61_p0 = scmp.ne.s32.totalorder %s1276_s22, %s1272_s21 }
  0x12   : > { %p1786_p1 = scmp.eq.s32.totalorder %s1381_s27, 0  ;;  %p205_p3 = scmp.eq.s32.totalorder %s849_s28, 1 }
  0x13   : > { %p850_p5 = scmp.ge.s32.totalorder %s1292_s26, 1  ;;  %p212_p7 = scmp.lt.s32.totalorder %s1292_s26, 3 }
  0x14   : > { %p1390_p4 = por %p1786_p1, %p61_p0  ;;  %p1395_p6 = por %p205_p3, %p61_p0 }
  0x15   : > { %p1400_p8 = pnand %p850_p5, %p212_p7  ;;  %s1294_s8 = smov [#allocation7]  }
  0x16   : > { %s1801_s29 = scalar_select %p1390_p4, 1, 0 }
  0x17   : > { %s1802_s30 = scalar_select %p1395_p6, 1, 0 }
  0x18   : > { %s1804_s7 = scalar_select %p1400_p8, 1, 0 }
  0x19   : > { %1803 = sst [smem:[#allocation21_spill]] %s1802_s30  ;;  %s224_s9 = sshll.u32 %s1294_s8, 4  ;;  %s1404_s9 = int_to_ptr.vmem [resolvable:$true] %s224_s9 }
  0x1a   : > { %p911_p9 = pneg %p1400_p8  ;;  %s1295_s11 = smov [#allocation8]  }
  0x1b   : > { %s237_s12 = sshll.u32 %s1295_s11, 4  ;;  %s1296_s13 = smov [#allocation10]   ;;  %s1415_s12 = int_to_ptr.vmem [resolvable:$true] %s237_s12 }
  0x1c   : > { %p1411_p11 = pnand %p911_p9, %p1786_p1  ;;  %s1417_s14 = sshll.u32 %s1296_s13, 4  ;;  %s251_s14 = int_to_ptr.vmem [resolvable:$true] %s1417_s14 }
  0x1d   : > { %s1806_s2 = sld [smem:[#allocation23_spill]] }
  0x1e   : > { %p1427_p13 = pneg %p1411_p11 }
  0x23   : > { %s1022_s17 = scalar_lea.hbm %s1806_s2, 256 }
  0x24   : > { %p1023_p12 = scmp.ne.s32.totalorder %s1806_s2, %s1022_s17  ;;  %p1029_p5 = scmp.lt.u32.totalorder %s1022_s17, %s1806_s2 }
  0x26   : > { %p1025_p0 = pnand %p1427_p13, %p1023_p12 }
  0x28   : > { %p1026_p3 = pneg %p1025_p0 }
  0x2a   : > { %p1031_p7 = pnand %p1029_p5, %p1026_p3 }
  0x2c   : > { %1034 = shalt.err (!%p1031_p7)
}
  0x2d   : > { %s1035_s11 = scalar_lea.vmem %s1404_s9, 256  ;;  %p1043_p2 = scmp.lt.s32.totalorder %s1404_s9, %s1404_s9 }
  0x2e   : > { %p1036_p9 = scmp.ne.s32.totalorder %s1404_s9, %s1035_s11  ;;  %p1044_p6 = scmp.lt.s32.totalorder %s1035_s11, %s1035_s11 }
  0x30   : > { %p1038_p10 = pnand %p1036_p9, %p1427_p13  ;;  %p1045_p12 = por %p1044_p6, %p1043_p2 }
  0x32   : > { %p1039_p1 = pneg %p1038_p10 }
  0x34   : > { %p1046_p0 = pnand %p1045_p12, %p1039_p1 }
  0x36   : > { %1049 = shalt.err (!%p1046_p0)
}
  0x37   : > { %s1791_s13 = smov 128   ;;  %s1793_s15 = smov 8  }
  0x38   : > { %914 = dma.hbm_to_vmem [thread:$0]  (!%p1411_p11), %s1806_s2, 256, %s1404_s9, [#allocation6], %s1791_s13, %s1791_s13, %s1793_s15  }
  0x39   : > { %s1808_s3 = sld [smem:[#allocation24_spill]] }
  0x3f   : > { %s1050_s28 = scalar_lea.hbm %s1808_s3, 256 }
  0x40   : > { %p1051_p1 = scmp.ne.s32.totalorder %s1808_s3, %s1050_s28  ;;  %p1057_p10 = scmp.lt.u32.totalorder %s1050_s28, %s1808_s3 }
  0x42   : > { %p1053_p2 = pnand %p1051_p1, %p1427_p13 }
  0x44   : > { %p1054_p6 = pneg %p1053_p2 }
  0x46   : > { %p1059_p3 = pnand %p1057_p10, %p1054_p6 }
  0x48   : > { %1062 = shalt.err (!%p1059_p3)
}
  0x49   : > { %s1063_s9 = scalar_lea.vmem %s1415_s12, 256  ;;  %p1071_p12 = scmp.lt.s32.totalorder %s1415_s12, %s1415_s12 }
  0x4a   : > { %p1064_p5 = scmp.ne.s32.totalorder %s1415_s12, %s1063_s9  ;;  %p1072_p0 = scmp.lt.s32.totalorder %s1063_s9, %s1063_s9 }
  0x4c   : > { %p1066_p7 = pnand %p1064_p5, %p1427_p13  ;;  %p1073_p1 = por %p1072_p0, %p1071_p12 }
  0x4e   : > { %p1067_p9 = pneg %p1066_p7 }
  0x50   : > { %p1074_p2 = pnand %p1073_p1, %p1067_p9 }
  0x52   : > { %1077 = shalt.err (!%p1074_p2)
}
  0x53   : > { %917 = dma.hbm_to_vmem [thread:$0]  (!%p1411_p11), %s1808_s3, 256, %s1415_s12, [#allocation9], %s1791_s13, %s1791_s13, %s1793_s15  }
  0x54   : > { %s1809_s4 = sld [smem:[#allocation25_spill]] }
  0x5a   : > { %s1078_s18 = scalar_lea.hbm %s1809_s4, 256 }
  0x5b   : > { %p1079_p6 = scmp.ne.s32.totalorder %s1809_s4, %s1078_s18  ;;  %p1085_p5 = scmp.lt.u32.totalorder %s1078_s18, %s1809_s4 }
  0x5d   : > { %p1081_p10 = pnand %p1079_p6, %p1427_p13 }
  0x5f   : > { %p1082_p3 = pneg %p1081_p10 }
  0x61   : > { %p1087_p7 = pnand %p1085_p5, %p1082_p3 }
  0x63   : > { %1090 = shalt.err (!%p1087_p7)
}
  0x64   : > { %s1091_s9 = scalar_lea.vmem %s251_s14, 256  ;;  %p1099_p1 = scmp.lt.s32.totalorder %s251_s14, %s251_s14 }
  0x65   : > { %p1092_p9 = scmp.ne.s32.totalorder %s251_s14, %s1091_s9  ;;  %p1100_p2 = scmp.lt.s32.totalorder %s1091_s9, %s1091_s9 }
  0x67   : > { %p1094_p12 = pnand %p1092_p9, %p1427_p13  ;;  %p1101_p4 = por %p1100_p2, %p1099_p1 }
  0x69   : > { %p1095_p0 = pneg %p1094_p12 }
  0x6b   : > { %p1102_p8 = pnand %p1101_p4, %p1095_p0 }
  0x6d   : > { %1105 = shalt.err (!%p1102_p8)
}
  0x6e   : > { %920 = dma.hbm_to_vmem [thread:$0]  (!%p1411_p11), %s1809_s4, 256, %s251_s14, [#allocation9], %s1791_s13, %s1791_s13, %s1793_s15  }
  0x6f   : > { %s1299_s30 = smov [#allocation11]   ;;  %s1810_s5 = sld [smem:[#allocation26_spill]] }
  0x70   : > { %s263_s16 = sshll.u32 %s1299_s30, 4  ;;  %s264_s16 = int_to_ptr.vmem [resolvable:$true] %s263_s16 }
  0x75   : > { %s1106_s19 = scalar_lea.hbm %s1810_s5, 256 }
  0x76   : > { %p1107_p4 = scmp.ne.s32.totalorder %s1810_s5, %s1106_s19  ;;  %p1113_p10 = scmp.lt.u32.totalorder %s1106_s19, %s1810_s5 }
  0x78   : > { %p1109_p8 = pnand %p1107_p4, %p1427_p13 }
  0x7a   : > { %p1110_p6 = pneg %p1109_p8 }
  0x7c   : > { %p1115_p3 = pnand %p1113_p10, %p1110_p6 }
  0x7e   : > { %1118 = shalt.err (!%p1115_p3)
}
  0x7f   : > { %s1119_s14 = scalar_lea.vmem %s264_s16, 256  ;;  %p1127_p12 = scmp.lt.s32.totalorder %s264_s16, %s264_s16 }
  0x80   : > { %p1120_p5 = scmp.ne.s32.totalorder %s264_s16, %s1119_s14  ;;  %p1128_p0 = scmp.lt.s32.totalorder %s1119_s14, %s1119_s14 }
  0x82   : > { %p1122_p7 = pnand %p1120_p5, %p1427_p13  ;;  %p1129_p1 = por %p1128_p0, %p1127_p12 }
  0x84   : > { %p1123_p9 = pneg %p1122_p7 }
  0x86   : > { %p1130_p2 = pnand %p1129_p1, %p1123_p9 }
  0x88   : > { %1133 = shalt.err (!%p1130_p2)
}
  0x89   : > { %923 = dma.hbm_to_vmem [thread:$0]  (!%p1411_p11), %s1810_s5, 256, %s264_s16, [#allocation12], %s1791_s13, %s1791_s13, %s1793_s15  }
  0x8a   : > { %s39_s20 = sadd.s32 1, %s1288_s25  ;;  %s48_s10 = sadd.s32 1, %s1280_s23 }
  0x8b   : > { %p41_p13 = scmp.ge.s32.totalorder %s39_s20, 2  ;;  %p55_p4 = scmp.ne.s32.totalorder %s1280_s23, %s1276_s22 }
  0x8c   : > { %p56_p8 = scmp.eq.s32.totalorder %s1292_s26, 0  ;;  %p939_p6 = scmp.lt.s32.totalorder %s1292_s26, 2 }
  0x8d   : > { %s1835_s20 = smov (%p41_p13, %s39_s20), 0  ;;  %p1811_p3 = scmp.eq.s32.totalorder %s1381_s27, 1 }
  0x8e   : > { %p57_p10 = por %p56_p8, %p55_p4  ;;  %s43_s17 = ssub.s32 %s1288_s25, %s1835_s20 }
  0x8f   : > { %p1530_p5 = por %p1811_p3, %p55_p4  ;;  %s277_s18 = sand.u32 1, %s1280_s23  }
  0x90   : > { %p46_p7 = scmp.eq.s32.totalorder %s43_s17, 0  ;;  %s1537_s16 = sshll.u32 %s277_s18, 4 }
  0x91   : > { %s886_s19 = sshll.u32 %s1288_s25, 8  ;;  %s1813_s0 = sld [smem:[#allocation22_spill]] }
  0x92   : > { %s1541_s28 = scalar_select %p46_p7, %s1280_s23, %s48_s10  }
  0x93   : > { %s281_s14 = scalar_lea.vmem [#allocation2], %s1537_s16  ;;  %p1551_p11 = pnand %p939_p6, %p57_p10 }
  0x94   : > { %s290_s12 = sshll.u32 %s281_s14, 4  ;;  %s1560_s8 = scalar_lea.hbm %s1780_s1, %s886_s19  ;;  %s1555_s12 = int_to_ptr.vmem [resolvable:$true] %s290_s12 }
  0x95   : > { %s1562_s11 = scalar_lea.sflag [#allocation3], %s277_s18  ;;  %p1136_p12 = pneg %p1551_p11 }
  0x97   : > { %s1546_s9 = scalar_lea.hbm %s1813_s0, %s886_s19  ;;  %s1139_s2 = scalar_lea.hbm %s1813_s0, 512 }
  0x98   : > { %s1134_s13 = scalar_lea.hbm %s1546_s9, 256  ;;  %p1140_p2 = scmp.lt.u32.totalorder %s1546_s9, %s1813_s0 }
  0x99   : > { %p1135_p9 = scmp.ne.s32.totalorder %s1546_s9, %s1134_s13  ;;  %p1141_p13 = scmp.lt.u32.totalorder %s1139_s2, %s1134_s13 }
  0x9a   : > { %p1143_p8 = scmp.lt.u32.totalorder %s1134_s13, %s1546_s9 }
  0x9b   : > { %p1137_p0 = pnand %p1136_p12, %p1135_p9  ;;  %p1142_p4 = por %p1141_p13, %p1140_p2 }
  0x9d   : > { %p1138_p1 = pneg %p1137_p0  ;;  %p1144_p6 = por %p1143_p8, %p1142_p4 }
  0x9f   : > { %p1145_p10 = pnand %p1144_p6, %p1138_p1 }
  0xa1   : > { %1148 = shalt.err (!%p1145_p10)
}
  0xa2   : > { %s1149_s18 = scalar_lea.vmem %s1555_s12, 256  ;;  %s1300_s15 = smov [#allocation2]  }
  0xa3   : > { %p1150_p3 = scmp.ne.s32.totalorder %s1555_s12, %s1149_s18  ;;  %s1154_s19 = sshll.u32 %s1300_s15, 4  ;;  %s1155_s19 = int_to_ptr.vmem [resolvable:$false] %s1154_s19 }
  0xa4   : > { %s1156_s3 = scalar_lea.vmem %s1155_s19, 512  ;;  %p1157_p0 = scmp.lt.s32.totalorder %s1555_s12, %s1155_s19 }
  0xa5   : > { %p1152_p7 = pnand %p1150_p3, %p1136_p12  ;;  %p1158_p2 = scmp.lt.s32.totalorder %s1156_s3, %s1149_s18 }
  0xa7   : > { %p1153_p9 = pneg %p1152_p7  ;;  %p1159_p13 = por %p1158_p2, %p1157_p0 }
  0xa9   : > { %p1160_p4 = pnand %p1159_p13, %p1153_p9 }
  0xab   : > { %1163 = shalt.err (!%p1160_p4)
}
  0xac   : > { %s1815_s2 = smov 8   ;;  %s1816_s4 = smov 128  }
  0xad   : > { %927 = dma.hbm_to_vmem [thread:$0]  (!%p1551_p11), %s1546_s9, 256, %s1555_s12, %s1562_s11, %s1816_s4, %s1816_s4, %s1815_s2  }
  0xae   : > { %s304_s13 = scalar_lea.vmem [#allocation5], %s1537_s16  ;;  %s300_s17 = sand.u32 1, %s1292_s26  }
  0xaf   : > { %s312_s10 = sshll.u32 %s304_s13, 4  ;;  %s1597_s14 = scalar_lea.sflag [#allocation6], %s300_s17  ;;  %s1595_s10 = int_to_ptr.vmem [resolvable:$true] %s312_s10 }
  0xb0   : > { %s1164_s18 = scalar_lea.hbm %s1560_s8, 256  ;;  %s1169_s3 = scalar_lea.hbm %s1780_s1, 512 }
  0xb1   : > { %p1165_p1 = scmp.ne.s32.totalorder %s1560_s8, %s1164_s18  ;;  %p1170_p10 = scmp.lt.u32.totalorder %s1560_s8, %s1780_s1 }
  0xb2   : > { %p1171_p3 = scmp.lt.u32.totalorder %s1169_s3, %s1164_s18  ;;  %p1173_p9 = scmp.lt.u32.totalorder %s1164_s18, %s1560_s8 }
  0xb3   : > { %p1167_p8 = pnand %p1165_p1, %p1136_p12 }
  0xb4   : > { %p1172_p7 = por %p1171_p3, %p1170_p10 }
  0xb5   : > { %p1168_p6 = pneg %p1167_p8 }
  0xb6   : > { %p1174_p0 = por %p1173_p9, %p1172_p7 }
  0xb8   : > { %p1175_p2 = pnand %p1174_p0, %p1168_p6 }
  0xba   : > { %1178 = shalt.err (!%p1175_p2)
}
  0xbb   : > { %s1179_s16 = scalar_lea.vmem %s1595_s10, 256  ;;  %s1301_s9 = smov [#allocation5]  }
  0xbc   : > { %p1180_p13 = scmp.ne.s32.totalorder %s1595_s10, %s1179_s16  ;;  %s1184_s12 = sshll.u32 %s1301_s9, 4  ;;  %s1185_s12 = int_to_ptr.vmem [resolvable:$false] %s1184_s12 }
  0xbd   : > { %s1186_s0 = scalar_lea.vmem %s1185_s12, 512  ;;  %p1187_p8 = scmp.lt.s32.totalorder %s1595_s10, %s1185_s12 }
  0xbe   : > { %p1182_p4 = pnand %p1180_p13, %p1136_p12  ;;  %p1188_p10 = scmp.lt.s32.totalorder %s1186_s0, %s1179_s16 }
  0xc0   : > { %p1183_p1 = pneg %p1182_p4  ;;  %p1189_p3 = por %p1188_p10, %p1187_p8 }
  0xc2   : > { %p1190_p7 = pnand %p1189_p3, %p1183_p1 }
  0xc4   : > { %1193 = shalt.err (!%p1190_p7)
}
  0xc5   : > { %930 = dma.hbm_to_vmem [thread:$0]  (!%p1551_p11), %s1560_s8, 256, %s1595_s10, %s1597_s14, %s1816_s4, %s1816_s4, %s1815_s2  }
  0xc6   : > { %p1817_p12 = scmp.ne.s32.totalorder %s1804_s7, 0 }
  0xc7   : > { %s1629_s5 = sand.u32 (!%p1817_p12), 1, %s1276_s22   ;;  %p1818_p6 = scmp.ne.s32.totalorder (!%p1817_p12), %s1801_s29, 0 }
  0xc8   : > { %324 = sbr.rel (%p1817_p12) target bundleno = 976 (0x3d0), region = 44  ;;  %s1632_s11 = sshll.u32 (!%p1817_p12), %s1629_s5, 4 }
  0xc9   : > { %s327_s21 = scalar_lea.sflag (!%p1817_p12), [#allocation3], %s1629_s5  ;;  %s330_s13 = scalar_lea.vmem (!%p1817_p12), [#allocation2], %s1632_s11 }
  0xcf   : > { %1247 = dma.done.wait (%p1818_p6), %s327_s21, 256  }
  0xd0   : > { %1249 = vsyncadd (%p1818_p6), %s327_s21, 4294967040  ;;  %s335_s7 = sand.u32 1, %s1381_s27   ;;  %s339_s2 = scalar_lea.vmem [#allocation5], %s1632_s11 }
  0xd1   : > { %s336_s8 = scalar_lea.sflag [#allocation6], %s335_s7 }
  0xd2   : > { %1251 = dma.done.wait (%p1818_p6), %s336_s8, 256  }
  0xd3   : > { %1253 = vsyncadd (%p1818_p6), %s336_s8, 4294967040  ;;  %p1819_p11 = scmp.eq.s32.totalorder %s1381_s27, 0 }
  0xd5   : > { %1255 = dma.done.wait (%p1819_p11), [#allocation6], 256   ;;  %p1820_p9 = pmov %p1819_p11 }
  0xd7   : > { %1257 = vsyncadd (%p1820_p9), [#allocation6], 4294967040  ;;  %p1821_p0 = pmov %p1820_p9 }
  0xd9   : > { %1259 = dma.done.wait (%p1821_p0), [#allocation9], 512   ;;  %p1822_p2 = pmov %p1821_p0 }
  0xda   : > { %p1823_p13 = pmov %p1821_p0 }
  0xdb   : > { %1261 = vsyncadd (%p1822_p2), [#allocation9], 4294966784 }
  0xdc   : > { %1263 = dma.done.wait (%p1823_p13), [#allocation12], 256   ;;  %p1824_p4 = pmov %p1821_p0 }
  0xdd   : > { %v1013_v0 = vld [vmem:[%s330_s13] ss:$8 sps:$4 sm:$0xff]   ;;  %v1015_v1 = vld [vmem:[%s330_s13 + $0x4] ss:$8 sps:$4 sm:$0xff]   ;;  %s1302_s29 = smov 126   ;;  %s1303_s4 = smov 127   ;;  %v468_v33 = vlaneseq }
  0xde   : > { %1265 = vsyncadd (%p1824_p4), [#allocation12], 4294967040  ;;  %410 = vrot.lane.b32.xlu1 %v1013_v0, %s1302_s29  ;;  %402 = vrot.lane.b32.xlu0 %v1013_v0, %s1303_s4  ;;  %s1304_s10 = smov 125   ;;  %s1305_s27 = smov 124   ;;  %v1018_v2 = vld [vmem:[#allocation7 + $0x4] ss:$8 sps:$4 sm:$0xff]  }
  0xdf   : > { %500 = vmatprep.subr.bf16.mxu0 %v1015_v1  ;;  %s1306_s17 = smov 123   ;;  %s1307_s14 = smov 122   ;;  %vm496_vm0 = vcmask 130048   ;;  %v1309_v3 = vmov 0   ;;  %v475_v4 = vld [vmem:[#allocation10] sm:$0xff]  ;;  %v476_v5 = vld [vmem:[#allocation10 + $0x8] sm:$0xff] }
  0xe0   : > { %501 = vmatpush1.bf16.msra.mxu0 %v1013_v0  ;;  %874 = vmatprep.mubr.msk.bf16.mxu0 %vm496_vm0, %v1018_v2  ;;  %s1308_s18 = smov 121   ;;  %s1310_s15 = smov 120   ;;  %v1311_v6 = vmov 0.0|0.0   ;;  %v612_v7 = vld [vmem:[#allocation11 + $0x8] sm:$0xff]  ;;  %vm406_vm1 = vcmask 1039360   ;;  %vm414_vm2 = vcmask 1031168  }
  0xe1   : > { %1011 = vset.pattern.permute.xlu0 %v1309_v3  ;;  %1012 = vset.pattern.permute.xlu1 %v1309_v3  ;;  %vm422_vm3 = vcmask 1022976   ;;  %vm430_vm4 = vcmask 1014784   ;;  %vm438_vm5 = vcmask 1006592   ;;  %vm446_vm6 = vcmask 998400   ;;  %v1016_v32 = vld [vmem:[#allocation7] ss:$8 sps:$4 sm:$0xff]  }
  0xe2   : > { %412 = vrot.lane.b32.xlu1 %v1015_v1, %s1302_s29  ;;  %404 = vrot.lane.b32.xlu0 %v1015_v1, %s1303_s4  ;;  %vm454_vm7 = vcmask 990208   ;;  %vm462_vm8 = vcmask 982016   ;;  %v469_v34 = vand.u32 127, %v468_v33  ;;  %v1021_v49 = vld [vmem:[#allocation8 + $0x4] ss:$8 sps:$4 sm:$0xff]   ;;  %s388_s19 = scalar_lea.vmem [#allocation13], %s1632_s11 }
  0xe3   : > { %635 = vmatprep.subr.bf16.mxu1 %v1309_v3  ;;  %880 = vmatprep.mubr.msk.bf16.mxu1 %vm496_vm0, %v1021_v49  ;;  %v611_v50 = vld [vmem:[#allocation11] sm:$0xff]  ;;  %s699_s3 = sshll.u32 %s388_s19, 4  ;;  %s888_s16 = sshll.u32 %s1284_s24, 8  ;;  %s1725_s3 = int_to_ptr.vmem [resolvable:$true] %s699_s3 }
  0xe4   : > { %vm547_vm9 = vcmp.ge.s32.totalorder %v469_v34, 4  ;;  %vm549_vm10 = vcmp.lt.s32.totalorder %v469_v34, 20  ;;  %s1730_s0 = scalar_lea.hbm %s1785_s6, %s888_s16  ;;  %s685_s11 = scalar_lea.sflag [#allocation4], %s1629_s5 }
  0xe5   : > { %vm551_vm11 = vmand %vm547_vm9, %vm549_vm10  ;;  %s1194_s21 = scalar_lea.vmem %s1725_s3, 256  ;;  %s1312_s24 = smov [#allocation13]  }
  0xe6   : > { %420 = vrot.lane.b32.xlu1 %v1015_v1, %s1304_s10  ;;  %418 = vrot.lane.b32.xlu0 %v1013_v0, %s1304_s10  ;;  %vm877_vm12 = vmpackc.low %vm551_vm11, %vm551_vm11  ;;  %p1195_p1 = scmp.ne.s32.totalorder %s1725_s3, %s1194_s21  ;;  %s1198_s13 = sshll.u32 %s1312_s24, 4  ;;  %s1199_s13 = int_to_ptr.vmem [resolvable:$false] %s1198_s13 }
  0xe7   : > { %s1200_s7 = scalar_lea.vmem %s1199_s13, 512  ;;  %p1201_p3 = scmp.lt.s32.totalorder %s1725_s3, %s1199_s13 }
  0xe8   : > { %p1196_p8 = pnand %p1195_p1, %p1530_p5  ;;  %p1202_p7 = scmp.lt.s32.totalorder %s1200_s7, %s1194_s21 }
  0xea   : > { %428 = vrot.lane.b32.xlu1 %v1015_v1, %s1305_s27  ;;  %426 = vrot.lane.b32.xlu0 %v1013_v0, %s1305_s27  ;;  %p1197_p10 = pneg %p1196_p8  ;;  %p1203_p12 = por %p1202_p7, %p1201_p3 }
  0xec   : > { %p1204_p6 = pnand %p1203_p12, %p1197_p10 }
  0xee   : > { %436 = vrot.lane.b32.xlu1 %v1015_v1, %s1306_s17  ;;  %434 = vrot.lane.b32.xlu0 %v1013_v0, %s1306_s17 }
  0xf2   : > { %444 = vrot.lane.b32.xlu1 %v1015_v1, %s1307_s14  ;;  %442 = vrot.lane.b32.xlu0 %v1013_v0, %s1307_s14 }
  0xf6   : > { %452 = vrot.lane.b32.xlu1 %v1015_v1, %s1308_s18  ;;  %450 = vrot.lane.b32.xlu0 %v1013_v0, %s1308_s18 }
  0xfa   : > { %460 = vrot.lane.b32.xlu1 %v1015_v1, %s1310_s15  ;;  %458 = vrot.lane.b32.xlu0 %v1013_v0, %s1310_s15 }
  0xfe   : > { %479 = vperm.xlu0 %1011, %v475_v4   ;;  %484 = vperm.xlu1 %1012, %v476_v5  }
 0x102   : > { %563 = vrot.lane.b32.xlu0 %v1311_v6, %s1303_s4 }
 0x106   : > { %569 = vrot.lane.b32.xlu0 %v1311_v6, %s1302_s29 }
 0x10a   : > { %575 = vrot.lane.b32.xlu0 %v1311_v6, %s1304_s10 }
 0x10e   : > { %581 = vrot.lane.b32.xlu0 %v1311_v6, %s1305_s27 }
 0x112   : > { %587 = vrot.lane.b32.xlu0 %v1311_v6, %s1306_s17 }
 0x116   : > { %593 = vrot.lane.b32.xlu0 %v1311_v6, %s1307_s14 }
 0x11a   : > { %599 = vrot.lane.b32.xlu0 %v1311_v6, %s1308_s18 }
 0x11e   : > { %605 = vrot.lane.b32.xlu0 %v1311_v6, %s1310_s15 }
 0x122   : > { %620 = vperm.xlu0 %1011, %v612_v7  }
 0x150   : > { %v411_v8 = vpop.permute.xlu1 %410  ;;  %v403_v9 = vpop.permute.xlu0 %402 }
 0x154   : > { %v413_v10 = vpop.permute.xlu1 %412  ;;  %v405_v11 = vpop.permute.xlu0 %404 }
 0x155   : > { %502 = vmatprep.subr.bf16.mxu0 %v405_v11  ;;  %v407_v12 = vsel %vm406_vm1, %v403_v9, %v405_v11  ;;  %v415_v15 = vsel %vm414_vm2, %v411_v8, %v413_v10 }
 0x156   : > { %503 = vmatpush1.bf16.msra.mxu0 %v407_v12  ;;  %v1019_v12 = vld [vmem:[#allocation8] ss:$8 sps:$4 sm:$0xff]  }
 0x157   : > { %504 = vmatprep.subr.bf16.mxu0 %v413_v10 }
 0x158   : > { %v421_v13 = vpop.permute.xlu1 %420  ;;  %v419_v14 = vpop.permute.xlu0 %418 }
 0x159   : > { %v423_v16 = vsel %vm422_vm3, %v419_v14, %v421_v13 }
 0x15a   : > { %505 = vmatpush1.bf16.msra.mxu0 %v415_v15  ;;  %v676_v15 = vld [vmem:[%s339_s2] sm:$0xff] }
 0x15b   : > { %506 = vmatprep.subr.bf16.mxu0 %v421_v13 }
 0x15c   : > { %v429_v17 = vpop.permute.xlu1 %428  ;;  %v427_v18 = vpop.permute.xlu0 %426 }
 0x15d   : > { %v431_v19 = vsel %vm430_vm4, %v427_v18, %v429_v17 }
 0x15e   : > { %507 = vmatpush1.bf16.msra.mxu0 %v423_v16 }
 0x15f   : > { %508 = vmatprep.subr.bf16.mxu0 %v429_v17 }
 0x160   : > { %v437_v20 = vpop.permute.xlu1 %436  ;;  %v435_v21 = vpop.permute.xlu0 %434 }
 0x161   : > { %v439_v22 = vsel %vm438_vm5, %v435_v21, %v437_v20 }
 0x162   : > { %509 = vmatpush1.bf16.msra.mxu0 %v431_v19  ;;  %v677_v19 = vld [vmem:[%s339_s2 + $0x8] sm:$0xff] }
 0x163   : > { %510 = vmatprep.subr.bf16.mxu0 %v437_v20 }
 0x164   : > { %v445_v23 = vpop.permute.xlu1 %444  ;;  %v443_v24 = vpop.permute.xlu0 %442 }
 0x165   : > { %v447_v25 = vsel %vm446_vm6, %v443_v24, %v445_v23 }
 0x166   : > { %511 = vmatpush1.bf16.msra.mxu0 %v439_v22 }
 0x167   : > { %512 = vmatprep.subr.bf16.mxu0 %v445_v23 }
 0x168   : > { %v453_v26 = vpop.permute.xlu1 %452  ;;  %v451_v27 = vpop.permute.xlu0 %450 }
 0x169   : > { %v455_v28 = vsel %vm454_vm7, %v451_v27, %v453_v26 }
 0x16a   : > { %513 = vmatpush1.bf16.msra.mxu0 %v447_v25 }
 0x16b   : > { %514 = vmatprep.subr.bf16.mxu0 %v453_v26 }
 0x16c   : > { %v461_v29 = vpop.permute.xlu1 %460  ;;  %v459_v30 = vpop.permute.xlu0 %458 }
 0x16d   : > { %v463_v31 = vsel %vm462_vm8, %v459_v30, %v461_v29 }
 0x16e   : > { %515 = vmatpush1.bf16.msra.mxu0 %v455_v28 }
 0x16f   : > { %516 = vmatprep.subr.bf16.mxu0 %v461_v29 }
 0x172   : > { %517 = vmatpush1.bf16.msra.mxu0 %v463_v31 }
 0x175   : > { %533 = vmatmul.mubr.bf16.vlgmr.msra.gmra.mrb[0].mxu0 %v1016_v32 }
 0x17d   : > { %v480_v35 = vpop.permute.xlu0 %479  ;;  %v485_v37 = vpop.permute.xlu1 %484 }
 0x181   : > { %v564_v51 = vpop.permute.xlu0 %563 }
 0x185   : > { %v570_v52 = vpop.permute.xlu0 %569 }
 0x189   : > { %v576_v53 = vpop.permute.xlu0 %575 }
 0x18d   : > { %v582_v56 = vpop.permute.xlu0 %581 }
 0x191   : > { %v588_v61 = vpop.permute.xlu0 %587 }
 0x195   : > { %v594_v0 = vpop.permute.xlu0 %593 }
 0x199   : > { %v600_v6 = vpop.permute.xlu0 %599 }
 0x19d   : > { %v606_v9 = vpop.permute.xlu0 %605 }
 0x1a1   : > { %v621_v18 = vpop.permute.xlu0 %620 }
 0x248   : > { %v534_v36 = vpop.f32.mrb[0].mxu0 }
 0x249   : > { %v535_v38 = vadd.f32 %v534_v36, %v480_v35  ;;  %v536_v39 = vpop.f32.mrb[1].mxu0 }
 0x24a   : > { %v538_v40 = vpop.f32.mrb[2].mxu0 }
 0x24b   : > { %v543_v41 = vmax.f32 %v535_v38, 0.0  ;;  %v539_v42 = vadd.f32 %v538_v40, %v485_v37  ;;  %v540_v43 = vpop.f32.mrb[3].mxu0 }
 0x24d   : > { %v545_v44 = vmax.f32 %v539_v42, 0.0  ;;  %v553_v45 = vsel %vm551_vm11, %v543_v41, 0.0 }
 0x24f   : > { %v555_v46 = vsel %vm551_vm11, %v545_v44, 0.0  ;;  %v878_v47 = vpack.c.bf16 %v545_v44, %v543_v41 }
 0x250   : > { %v557_v48 = vpack.c.bf16 %v555_v46, %v553_v45 }
 0x251   : > { %879 = vmatpush1.bf16.msk.msra.mxu1 %vm877_vm12, %v878_v47 }
 0x252   : > { %561 = vrot.lane.b32.xlu1 %v557_v48, %s1303_s4  ;;  %637 = vmatprep.subr.bf16.mxu1 %v1309_v3 }
 0x256   : > { %567 = vrot.lane.b32.xlu1 %v557_v48, %s1302_s29 }
 0x25a   : > { %573 = vrot.lane.b32.xlu1 %v557_v48, %s1304_s10 }
 0x25e   : > { %579 = vrot.lane.b32.xlu1 %v557_v48, %s1305_s27 }
 0x262   : > { %585 = vrot.lane.b32.xlu1 %v557_v48, %s1306_s17 }
 0x266   : > { %591 = vrot.lane.b32.xlu1 %v557_v48, %s1307_s14 }
 0x26a   : > { %597 = vrot.lane.b32.xlu1 %v557_v48, %s1308_s18 }
 0x26e   : > { %603 = vrot.lane.b32.xlu1 %v557_v48, %s1310_s15 }
 0x272   : > { %615 = vperm.xlu1 %1012, %v611_v50  }
 0x2c4   : > { %v562_v54 = vpop.permute.xlu1 %561 }
 0x2c5   : > { %v565_v55 = vsel %vm406_vm1, %v562_v54, %v564_v51 }
 0x2c6   : > { %638 = vmatpush1.bf16.msra.mxu1 %v565_v55 }
 0x2c7   : > { %639 = vmatprep.subr.bf16.mxu1 %v1309_v3 }
 0x2c8   : > { %v568_v57 = vpop.permute.xlu1 %567 }
 0x2c9   : > { %v571_v58 = vsel %vm414_vm2, %v568_v57, %v570_v52 }
 0x2ca   : > { %640 = vmatpush1.bf16.msra.mxu1 %v571_v58 }
 0x2cb   : > { %641 = vmatprep.subr.bf16.mxu1 %v1309_v3 }
 0x2cc   : > { %v574_v59 = vpop.permute.xlu1 %573 }
 0x2cd   : > { %v577_v60 = vsel %vm422_vm3, %v574_v59, %v576_v53 }
 0x2ce   : > { %642 = vmatpush1.bf16.msra.mxu1 %v577_v60 }
 0x2cf   : > { %643 = vmatprep.subr.bf16.mxu1 %v1309_v3 }
 0x2d0   : > { %v580_v62 = vpop.permute.xlu1 %579 }
 0x2d1   : > { %v583_v63 = vsel %vm430_vm4, %v580_v62, %v582_v56 }
 0x2d2   : > { %644 = vmatpush1.bf16.msra.mxu1 %v583_v63 }
 0x2d3   : > { %645 = vmatprep.subr.bf16.mxu1 %v1309_v3 }
 0x2d4   : > { %v586_v1 = vpop.permute.xlu1 %585 }
 0x2d5   : > { %v589_v2 = vsel %vm438_vm5, %v586_v1, %v588_v61 }
 0x2d6   : > { %646 = vmatpush1.bf16.msra.mxu1 %v589_v2 }
 0x2d7   : > { %647 = vmatprep.subr.bf16.mxu1 %v1309_v3 }
 0x2d8   : > { %v592_v4 = vpop.permute.xlu1 %591 }
 0x2d9   : > { %v595_v5 = vsel %vm446_vm6, %v592_v4, %v594_v0 }
 0x2da   : > { %648 = vmatpush1.bf16.msra.mxu1 %v595_v5 }
 0x2db   : > { %649 = vmatprep.subr.bf16.mxu1 %v1309_v3 }
 0x2dc   : > { %v598_v7 = vpop.permute.xlu1 %597 }
 0x2dd   : > { %v601_v8 = vsel %vm454_vm7, %v598_v7, %v600_v6 }
 0x2de   : > { %650 = vmatpush1.bf16.msra.mxu1 %v601_v8 }
 0x2df   : > { %651 = vmatprep.subr.bf16.mxu1 %v1309_v3 }
 0x2e0   : > { %v604_v10 = vpop.permute.xlu1 %603 }
 0x2e1   : > { %v607_v11 = vsel %vm462_vm8, %v604_v10, %v606_v9 }
 0x2e2   : > { %652 = vmatpush1.bf16.msra.mxu1 %v607_v11 }
 0x2e5   : > { %668 = vmatmul.mubr.bf16.vlgmr.msra.gmra.mrb[0].mxu1 %v1019_v12 }
 0x2f1   : > { %v616_v13 = vpop.permute.xlu1 %615 }
 0x3b8   : > { %v669_v14 = vpop.f32.mrb[0].mxu1 }
 0x3b9   : > { %v670_v16 = vadd.f32 %v669_v14, %v616_v13  ;;  %v671_v17 = vpop.f32.mrb[1].mxu1 }
 0x3ba   : > { %v672_v3 = vpop.f32.mrb[2].mxu1 }
 0x3bb   : > { %v678_v20 = vadd.f32 %v676_v15, %v670_v16  ;;  %v673_v21 = vadd.f32 %v672_v3, %v621_v18  ;;  %v674_v22 = vpop.f32.mrb[3].mxu1 }
 0x3bd   : > { %v680_v23 = vmax.f32 %v678_v20, 0.0  ;;  %v679_v24 = vadd.f32 %v677_v19, %v673_v21 }
 0x3bf   : > { %682 = vst [vmem:[%s388_s19] sm:$0xff] %v680_v23  ;;  %v681_v25 = vmax.f32 %v679_v24, 0.0 }
 0x3c1   : > { %683 = vst [vmem:[%s388_s19 + $0x8] sm:$0xff] %v681_v25 }
 0x3c2   : > { %1207 = shalt.err (!%p1204_p6)
}
 0x3c3   : > { %s1208_s8 = scalar_lea.hbm %s1730_s0, 256  ;;  %s1212_s4 = scalar_lea.hbm %s1785_s6, 512 }
 0x3c4   : > { %p1209_p11 = scmp.ne.s32.totalorder %s1730_s0, %s1208_s8  ;;  %p1213_p2 = scmp.lt.u32.totalorder %s1730_s0, %s1785_s6 }
 0x3c5   : > { %p1214_p13 = scmp.lt.u32.totalorder %s1212_s4, %s1208_s8  ;;  %p1216_p1 = scmp.lt.u32.totalorder %s1208_s8, %s1730_s0 }
 0x3c6   : > { %p1210_p9 = pnand %p1209_p11, %p1530_p5 }
 0x3c7   : > { %p1215_p4 = por %p1214_p13, %p1213_p2 }
 0x3c8   : > { %p1211_p0 = pneg %p1210_p9 }
 0x3c9   : > { %p1217_p8 = por %p1216_p1, %p1215_p4 }
 0x3cb   : > { %p1218_p10 = pnand %p1217_p8, %p1211_p0 }
 0x3cd   : > { %1221 = shalt.err (!%p1218_p10)
}
 0x3ce   : > { %s1313_s17 = smov 128   ;;  %s1314_s14 = smov 8  }
 0x3cf   : > { %909 = dma.vmem_to_hbm [thread:$0]  (%p1530_p5), %s1725_s3, 256, %s1730_s0, %s685_s11, %s1313_s17, %s1313_s17, %s1314_s14  }
 0x3d0 PF: > { %s1825_s18 = sld [smem:[#allocation20_spill]]  ;;  %s1826_s15 = sld [smem:[#allocation21_spill]] }
 0x3d1   : > { %p1828_p7 = scmp.ge.s32.totalorder %s1292_s26, 2 }
 0x3d6   : > { %s714_s19 = sand.u32 1, %s1825_s18   ;;  %p1827_p3 = scmp.ne.s32.totalorder %s1826_s15, 0 }
 0x3d7   : > { %s715_s16 = scalar_lea.sflag [#allocation4], %s714_s19 }
 0x3d8   : > { %p932_p12 = pnand %p1828_p7, %p1827_p3 }
 0x3da   : > { %1267 = dma.done.wait (!%p932_p12), %s715_s16, 256  }
 0x3db   : > { %1269 = vsyncadd (!%p932_p12), %s715_s16, 4294967040  ;;  %s27_s26 = sadd.s32 1, %s1292_s26   ;;  %s1829_s21 = smov %s1276_s22 }
 0x3dc   : > { %p24_p6 = scmp.ge.s32.totalorder %s27_s26, 4   ;;  %s1830_s22 = smov %s1280_s23 }
 0x3dd   : > { %s1831_s23 = smov %s1541_s28  ;;  %s1832_s24 = smov %s1288_s25 }
 0x3de   : > { %s1833_s25 = smov %s1835_s20  ;;  %26 = sbr.rel (!%p24_p6) target bundleno = 16 (0x10), region = 118 }
 0x3e5   :  { %720 = vsyncpa [#allocation3], 1 }
 0x3e6   :  { %722 = vsyncpa [#allocation3 + $0x1], 1 }
 0x3e7   :  { %723 = vsyncpa [#allocation6], 1 }
 0x3e8   :  { %725 = vsyncpa [#allocation6 + $0x1], 1 }
 0x3e9   :  { %726 = vsyncpa [#allocation9], 1 }
 0x3ea   :  { %727 = vsyncpa [#allocation12], 1 }
 0x3eb   :  { %728 = vsyncpa [#allocation4], 1 }
 0x3ec   :  { %730 = vsyncpa [#allocation4 + $0x1], 1 }

</bundles_post_ra>
